<compile_context>
chip_gen: v7x
topology: tpu7x:2x2x1
jax: 0.10.0
libtpu: 0.0.40
codegen_flags: <defaults>
</compile_context>

<pallas_src>
from functools import partial

import jax
import jax.numpy as jnp
from jax.experimental import pallas as pl
from jax.experimental.pallas import tpu as pltpu

HIDDEN = 30
LANE = 128


def _round_up(v, m):
    return -(-v // m) * m


def _ac_kernel(xt_ref, w1t_ref, b1t_ref, w2t_ref, b2t_ref, w3t_ref, b3t_ref, out_ref, *, a_dim):
    # x^T tile: [Spad, TB]  (batch in lanes).
    xt = xt_ref[...]

    # Fused layer 1:  [64, Spad] @ [Spad, TB] -> actor hidden rows | critic hidden rows.
    h = jnp.dot(w1t_ref[...], xt, preferred_element_type=jnp.float32) + b1t_ref[...]
    h = jnp.maximum(h, 0.0)

    # Fused layer 2 (block-diagonal): actor/critic paths stay independent.  [64,64]@[64,TB]
    h = jnp.dot(w2t_ref[...], h, preferred_element_type=jnp.float32) + b2t_ref[...]
    h = jnp.maximum(h, 0.0)

    # Fused heads (block-diagonal): rows [0, A) are mu_head, row A is val_head, rest padding.
    y = jnp.dot(w3t_ref[...], h, preferred_element_type=jnp.float32) + b3t_ref[...]

    row = jax.lax.broadcasted_iota(jnp.int32, y.shape, 0)
    # mean rows: 2 * tanh(.) ; value row (and zero-padded rows): identity.
    out_ref[...] = jnp.where(row < a_dim, 2.0 * jnp.tanh(y), y).astype(out_ref.dtype)


def fuse_params(params):
    """One-time fusion: transpose, concatenate and block-diagonalize actor+critic weights,
    zero-padded to (8,128)-friendly shapes.  Call once and reuse across forward steps."""
    f32 = jnp.float32
    S, H = params["wa1"].shape
    A = params["wmu"].shape[1]
    HP = _round_up(2 * H, 8)               # 60 -> 64
    SP = _round_up(S, 8)                   # 4  -> 8
    OUT_ROWS = max(8, _round_up(A + 1, 8))  # 3 -> 8 (lane/sublane-aligned output slab)

    w1t = jnp.zeros((HP, SP), f32)
    w1t = w1t.at[:H, :S].set(params["wa1"].T)
    w1t = w1t.at[H:2 * H, :S].set(params["wv1"].T)
    b1t = jnp.zeros((HP, 1), f32)
    b1t = b1t.at[:H, 0].set(params["ba1"][0])
    b1t = b1t.at[H:2 * H, 0].set(params["bv1"][0])

    w2t = jnp.zeros((HP, HP), f32)
    w2t = w2t.at[:H, :H].set(params["wa2"].T)
    w2t = w2t.at[H:2 * H, H:2 * H].set(params["wv2"].T)
    b2t = jnp.zeros((HP, 1), f32)
    b2t = b2t.at[:H, 0].set(params["ba2"][0])
    b2t = b2t.at[H:2 * H, 0].set(params["bv2"][0])

    w3t = jnp.zeros((OUT_ROWS, HP), f32)
    w3t = w3t.at[:A, :H].set(params["wmu"].T)
    w3t = w3t.at[A, H:2 * H].set(params["wval"][:, 0])
    b3t = jnp.zeros((OUT_ROWS, 1), f32)
    b3t = b3t.at[:A, 0].set(params["bmu"][0])
    b3t = b3t.at[A, 0].set(params["bval"][0, 0])

    return (w1t, b1t, w2t, b2t, w3t, b3t)


def actor_critic_forward(x, fused, log_std, *, tb_max=4096):
    """Returns (action_mean, action_std, value) — actor_layer + critic_layer fused.

    `fused` is the tuple produced by fuse_params(params) (computed once, not per step).
    """
    w1t, b1t, w2t, b2t, w3t, b3t = fused
    B, S = x.shape
    SP = w1t.shape[1]
    HP = w1t.shape[0]
    OUT_ROWS = w3t.shape[0]
    A = log_std.shape[-1]

    # Batch lives in the lane dimension -> pad to a multiple of 128 and tile it.
    tb_max = _round_up(max(tb_max, LANE), LANE)
    Bp = _round_up(max(B, LANE), LANE)
    TB = min(tb_max, Bp)
    if Bp >= 4 * LANE and TB == Bp:
        # Large batch: keep >= 2 tiles so the "parallel" axis can use both v7x TensorCores.
        TB = _round_up(Bp // 2, LANE)
    Bp = _round_up(Bp, TB)
    n_tiles = Bp // TB

    # x^T with zero-padded state rows and batch columns: [SP, Bp], lane-dense DMA.
    xt = jnp.pad(x.astype(jnp.float32), ((0, Bp - B), (0, SP - S))).T

    # Advisory cost estimate.
    flops = 2 * Bp * (SP * HP + HP * HP + HP * OUT_ROWS)
    transcendentals = Bp * OUT_ROWS
    bytes_accessed = 4 * (SP * Bp + w1t.size + b1t.size + w2t.size + b2t.size
                          + w3t.size + b3t.size + OUT_ROWS * Bp)

    def resident(arr):
        # Weights / biases: full array, same block every grid step -> stay VMEM-resident.
        return pl.BlockSpec(arr.shape, lambda i: (0, 0))

    out = pl.pallas_call(
        partial(_ac_kernel, a_dim=A),
        out_shape=jax.ShapeDtypeStruct((OUT_ROWS, Bp), jnp.float32),
        grid=(n_tiles,),
        in_specs=[
            pl.BlockSpec((SP, TB), lambda i: (0, i)),   # x^T tiled over batch lanes
            resident(w1t), resident(b1t),
            resident(w2t), resident(b2t),
            resident(w3t), resident(b3t),
        ],
        out_specs=pl.BlockSpec((OUT_ROWS, TB), lambda i: (0, i)),
        compiler_params=pltpu.CompilerParams(
            dimension_semantics=("parallel",),          # batch tiles are independent
        ),
        cost_estimate=pl.CostEstimate(
            flops=int(flops),
            transcendentals=int(transcendentals),
            bytes_accessed=int(bytes_accessed),
        ),
    )(xt, w1t, b1t, w2t, b2t, w3t, b3t)

    action_mean = out[:A, :B].T                          # [B, A]
    value = out[A:A + 1, :B].T                           # [B, 1]
    # exp(log_std) is input-independent -> computed outside the kernel.
    action_std = jnp.broadcast_to(jnp.exp(log_std), (B, A))
    return action_mean, action_std, value


def init_params(key, state_dim, action_dim, hidden=HIDDEN):
    """Deterministic synthetic parameters (PyTorch-Linear-like uniform init)."""
    ks = jax.random.split(key, 12)

    def linear(kw, kb, fan_in, fan_out):
        bound = 1.0 / jnp.sqrt(float(fan_in))
        w = jax.random.uniform(kw, (fan_in, fan_out), jnp.float32, -bound, bound)
        b = jax.random.uniform(kb, (1, fan_out), jnp.float32, -bound, bound)
        return w, b

    wa1, ba1 = linear(ks[0], ks[1], state_dim, hidden)
    wa2, ba2 = linear(ks[2], ks[3], hidden, hidden)
    wmu, bmu = linear(ks[4], ks[5], hidden, action_dim)
    wv1, bv1 = linear(ks[6], ks[7], state_dim, hidden)
    wv2, bv2 = linear(ks[8], ks[9], hidden, hidden)
    wval, bval = linear(ks[10], ks[11], hidden, 1)
    log_std = jnp.zeros((1, action_dim), jnp.float32)  # nn.Parameter(torch.zeros(1, action_dim))

    return dict(
        wa1=wa1, ba1=ba1, wa2=wa2, ba2=ba2, wmu=wmu, bmu=bmu, log_std=log_std,
        wv1=wv1, bv1=bv1, wv2=wv2, bv2=bv2, wval=wval, bval=bval,
    )


def reference_forward(x, p):
    """Pure-JAX reference on the UNFUSED parameters (validates fusion + transposition)."""
    h = jnp.maximum(x @ p["wa1"] + p["ba1"], 0.0)
    h = jnp.maximum(h @ p["wa2"] + p["ba2"], 0.0)
    mean = 2.0 * jnp.tanh(h @ p["wmu"] + p["bmu"])
    std = jnp.exp(jnp.broadcast_to(p["log_std"], mean.shape))
    v = jnp.maximum(x @ p["wv1"] + p["bv1"], 0.0)
    v = jnp.maximum(v @ p["wv2"] + p["bv2"], 0.0)
    value = v @ p["wval"] + p["bval"]
    return mean, std, value


if __name__ == "__main__":
    # Small shapes consistent with a continuous-control PPO agent (e.g. Pendulum-like).
    batch, state_dim, action_dim = 8, 4, 2

    key = jax.random.PRNGKey(0)
    k_params, k_x = jax.random.split(key)
    params = init_params(k_params, state_dim, action_dim)
    fused = fuse_params(params)  # fused ONCE, reused across forward calls
    x = jax.random.normal(k_x, (batch, state_dim), jnp.float32)

    mean, std, value = jax.block_until_ready(
        actor_critic_forward(x, fused, params["log_std"]))
    ref_mean, ref_std, ref_value = reference_forward(x, params)

    assert mean.shape == (batch, action_dim)
    assert std.shape == (batch, action_dim)
    assert value.shape == (batch, 1)
    assert jnp.allclose(mean, ref_mean, atol=1e-5, rtol=1e-5)
    assert jnp.allclose(std, ref_std, atol=1e-5, rtol=1e-5)
    assert jnp.allclose(value, ref_value, atol=1e-5, rtol=1e-5)

    # Larger, non-multiple batch: exercises lane padding + a multi-tile "parallel" grid.
    xb = jax.random.normal(jax.random.PRNGKey(1), (600, state_dim), jnp.float32)
    mb, sb, vb = jax.block_until_ready(
        actor_critic_forward(xb, fused, params["log_std"]))
    rb_mean, rb_std, rb_value = reference_forward(xb, params)
    assert jnp.allclose(mb, rb_mean, atol=1e-5, rtol=1e-5)
    assert jnp.allclose(sb, rb_std, atol=1e-5, rtol=1e-5)
    assert jnp.allclose(vb, rb_value, atol=1e-5, rtol=1e-5)

    # TODO(synk): act()/evaluate() Normal-distribution sampling / log_prob / entropy is
    # host-side distribution glue, not a tensor hot path; only the network forward is in Pallas.
    print("KERNEL_OK")
</pallas_src>

<mosaic_0001>
module attributes {stable_mosaic.version = 11 : i64} {
  func.func @_ac_kernel(%arg0: i32, %arg1: memref<8x128xf32, #tpu.memory_space<vmem>>, %arg2: memref<64x8xf32, #tpu.memory_space<vmem>>, %arg3: memref<64x1xf32, #tpu.memory_space<vmem>>, %arg4: memref<64x64xf32, #tpu.memory_space<vmem>>, %arg5: memref<64x1xf32, #tpu.memory_space<vmem>>, %arg6: memref<8x64xf32, #tpu.memory_space<vmem>>, %arg7: memref<8x1xf32, #tpu.memory_space<vmem>>, %arg8: memref<8x128xf32, #tpu.memory_space<vmem>>) attributes {dimension_semantics = [#tpu.dimension_semantics<parallel>], iteration_bounds = array<i64: 1>, scalar_prefetch = 0 : i64, scratch_operands = 0 : i64, tpu.core_type = #tpu.core_type<tc>, window_params = [{transform_indices = @transform_0, window_bounds = array<i64: 8, 128>}, {pipeline_mode = #tpu.pipeline_mode<synchronous>, transform_indices = @transform_1, window_bounds = array<i64: 64, 8>}, {pipeline_mode = #tpu.pipeline_mode<synchronous>, transform_indices = @transform_2, window_bounds = array<i64: 64, 1>}, {pipeline_mode = #tpu.pipeline_mode<synchronous>, transform_indices = @transform_3, window_bounds = array<i64: 64, 64>}, {pipeline_mode = #tpu.pipeline_mode<synchronous>, transform_indices = @transform_4, window_bounds = array<i64: 64, 1>}, {pipeline_mode = #tpu.pipeline_mode<synchronous>, transform_indices = @transform_5, window_bounds = array<i64: 8, 64>}, {pipeline_mode = #tpu.pipeline_mode<synchronous>, transform_indices = @transform_6, window_bounds = array<i64: 8, 1>}, {transform_indices = @transform_7, window_bounds = array<i64: 8, 128>}]} {
    %c0 = arith.constant 0 : index
    %c0_0 = arith.constant 0 : index
    %0 = vector.load %arg1[%c0, %c0_0] : memref<8x128xf32, #tpu.memory_space<vmem>>, vector<8x128xf32>
    %c0_1 = arith.constant 0 : index
    %c0_2 = arith.constant 0 : index
    %1 = vector.load %arg2[%c0_1, %c0_2] : memref<64x8xf32, #tpu.memory_space<vmem>>, vector<64x8xf32>
    %cst = arith.constant dense<0.000000e+00> : vector<64x128xf32>
    %2 = tpu.matmul %1, %0, %cst {dimension_numbers = #tpu.dot_dimension_numbers<[1], [0], [0], [1], [0, 0, 1, 1], [], []>} : vector<64x8xf32>, vector<8x128xf32>, vector<64x128xf32> -> vector<64x128xf32>
    %c0_3 = arith.constant 0 : index
    %c0_4 = arith.constant 0 : index
    %3 = vector.load %arg3[%c0_3, %c0_4] : memref<64x1xf32, #tpu.memory_space<vmem>>, vector<64x1xf32>
    %4 = vector.broadcast %3 : vector<64x1xf32> to vector<64x128xf32>
    %5 = arith.addf %2, %4 : vector<64x128xf32>
    %cst_5 = arith.constant 0.000000e+00 : f32
    %6 = vector.broadcast %cst_5 : f32 to vector<64x128xf32>
    %7 = arith.maximumf %5, %6 : vector<64x128xf32>
    %c0_6 = arith.constant 0 : index
    %c0_7 = arith.constant 0 : index
    %8 = vector.load %arg4[%c0_6, %c0_7] : memref<64x64xf32, #tpu.memory_space<vmem>>, vector<64x64xf32>
    %cst_8 = arith.constant dense<0.000000e+00> : vector<64x128xf32>
    %9 = tpu.matmul %8, %7, %cst_8 {dimension_numbers = #tpu.dot_dimension_numbers<[1], [0], [0], [1], [0, 0, 1, 1], [], []>} : vector<64x64xf32>, vector<64x128xf32>, vector<64x128xf32> -> vector<64x128xf32>
    %c0_9 = arith.constant 0 : index
    %c0_10 = arith.constant 0 : index
    %10 = vector.load %arg5[%c0_9, %c0_10] : memref<64x1xf32, #tpu.memory_space<vmem>>, vector<64x1xf32>
    %11 = vector.broadcast %10 : vector<64x1xf32> to vector<64x128xf32>
    %12 = arith.addf %9, %11 : vector<64x128xf32>
    %cst_11 = arith.constant 0.000000e+00 : f32
    %13 = vector.broadcast %cst_11 : f32 to vector<64x128xf32>
    %14 = arith.maximumf %12, %13 : vector<64x128xf32>
    %c0_12 = arith.constant 0 : index
    %c0_13 = arith.constant 0 : index
    %15 = vector.load %arg6[%c0_12, %c0_13] : memref<8x64xf32, #tpu.memory_space<vmem>>, vector<8x64xf32>
    %cst_14 = arith.constant dense<0.000000e+00> : vector<8x128xf32>
    %16 = tpu.matmul %15, %14, %cst_14 {dimension_numbers = #tpu.dot_dimension_numbers<[1], [0], [0], [1], [0, 0, 1, 1], [], []>} : vector<8x64xf32>, vector<64x128xf32>, vector<8x128xf32> -> vector<8x128xf32>
    %c0_15 = arith.constant 0 : index
    %c0_16 = arith.constant 0 : index
    %17 = vector.load %arg7[%c0_15, %c0_16] : memref<8x1xf32, #tpu.memory_space<vmem>>, vector<8x1xf32>
    %18 = vector.broadcast %17 : vector<8x1xf32> to vector<8x128xf32>
    %19 = arith.addf %16, %18 : vector<8x128xf32>
    %20 = tpu.iota {dimensions = array<i32: 0>} : vector<8x128xi32>
    %c2_i32 = arith.constant 2 : i32
    %21 = vector.broadcast %c2_i32 : i32 to vector<8x128xi32>
    %22 = arith.cmpi slt, %20, %21 : vector<8x128xi32>
    %23 = math.tanh %19 : vector<8x128xf32>
    %cst_17 = arith.constant 2.000000e+00 : f32
    %24 = vector.broadcast %cst_17 : f32 to vector<8x128xf32>
    %25 = arith.mulf %24, %23 : vector<8x128xf32>
    %26 = arith.select %22, %25, %19 : vector<8x128xi1>, vector<8x128xf32>
    %c0_18 = arith.constant 0 : index
    %c0_19 = arith.constant 0 : index
    %27 = vector.load %arg8[%c0_18, %c0_19] : memref<8x128xf32, #tpu.memory_space<vmem>>, vector<8x128xf32>
    tpu.vector_store %arg8[%c0_18, %c0_19], %26 {strides = array<i32>} : memref<8x128xf32, #tpu.memory_space<vmem>>, vector<8x128xf32>,
    return
  }
  func.func @transform_0(%arg0: i32) -> (i32, i32) {
    %c0_i32 = arith.constant 0 : i32
    %c0_i32_0 = arith.constant 0 : i32
    return %c0_i32, %arg0 : i32, i32
  }
  func.func @transform_1(%arg0: i32) -> (i32, i32) {
    %c0_i32 = arith.constant 0 : i32
    %c0_i32_0 = arith.constant 0 : i32
    %c0_i32_1 = arith.constant 0 : i32
    return %c0_i32, %c0_i32_0 : i32, i32
  }
  func.func @transform_2(%arg0: i32) -> (i32, i32) {
    %c0_i32 = arith.constant 0 : i32
    %c0_i32_0 = arith.constant 0 : i32
    %c0_i32_1 = arith.constant 0 : i32
    return %c0_i32, %c0_i32_0 : i32, i32
  }
  func.func @transform_3(%arg0: i32) -> (i32, i32) {
    %c0_i32 = arith.constant 0 : i32
    %c0_i32_0 = arith.constant 0 : i32
    %c0_i32_1 = arith.constant 0 : i32
    return %c0_i32, %c0_i32_0 : i32, i32
  }
  func.func @transform_4(%arg0: i32) -> (i32, i32) {
    %c0_i32 = arith.constant 0 : i32
    %c0_i32_0 = arith.constant 0 : i32
    %c0_i32_1 = arith.constant 0 : i32
    return %c0_i32, %c0_i32_0 : i32, i32
  }
  func.func @transform_5(%arg0: i32) -> (i32, i32) {
    %c0_i32 = arith.constant 0 : i32
    %c0_i32_0 = arith.constant 0 : i32
    %c0_i32_1 = arith.constant 0 : i32
    return %c0_i32, %c0_i32_0 : i32, i32
  }
  func.func @transform_6(%arg0: i32) -> (i32, i32) {
    %c0_i32 = arith.constant 0 : i32
    %c0_i32_0 = arith.constant 0 : i32
    %c0_i32_1 = arith.constant 0 : i32
    return %c0_i32, %c0_i32_0 : i32, i32
  }
  func.func @transform_7(%arg0: i32) -> (i32, i32) {
    %c0_i32 = arith.constant 0 : i32
    %c0_i32_0 = arith.constant 0 : i32
    return %c0_i32, %arg0 : i32, i32
  }
}

</mosaic_0001>

<bundles_post_ra>
// kernel: tpu_custom_call.1
= control target key start
LH: loop header
LB: loop body
LE: loop exit
PB: predicated region body
PF: predicated region fallthrough
CT: control target
= control target key end

     0   :  { %vm84_vm0 = vcmask 64512   ;;  %v690_v4 = vmov 0   ;;  %s869_s0 = inlined_call_operand.vmem [shape: f32[8,128], index: 0, kind: input, shape index: {}]   ;;  %s870_s1 = inlined_call_operand.vmem [shape: f32[64,8], index: 1, kind: input, shape index: {}]   ;;  %s871_s2 = inlined_call_operand.vmem [shape: f32[64,1], index: 2, kind: input, shape index: {}]   ;;  %s872_s3 = inlined_call_operand.vmem [shape: f32[64,64], index: 3, kind: input, shape index: {}]   ;;  %s873_s4 = inlined_call_operand.vmem [shape: f32[64,1], index: 4, kind: input, shape index: {}]   ;;  %s874_s5 = inlined_call_operand.vmem [shape: f32[8,64], index: 5, kind: input, shape index: {}]   ;;  %s875_s6 = inlined_call_operand.vmem [shape: f32[8,1], index: 6, kind: input, shape index: {}]   ;;  %s876_s7 = inlined_call_operand.hbm [shape: f32[8,128], index: 7, kind: output, shape index: {}]  }
   0x1   :  { %v27_v0 = vld [vmem:[%s869_s0] sm:$0xff]  ;;  %v29_v2 = vld [vmem:[%s870_s1 + $0x8] sm:$0xff]  ;;  %v30_v3 = vld [vmem:[%s870_s1 + $0x10] sm:$0xff]  ;;  %662 = vset.pattern.permute.xlu0 %v690_v4  ;;  %663 = vset.pattern.permute.xlu1 %v690_v4 }
   0x2   :  { %v28_v1 = vld [vmem:[%s870_s1] sm:$0xff]  ;;  %568 = vmatprep.subr.mxu0 %v27_v0  ;;  %v38_v6 = vld [vmem:[%s871_s2 + $0x10] sm:$0xff]  ;;  %v31_v7 = vld [vmem:[%s870_s1 + $0x18] sm:$0xff] }
   0x3   :  { %570 = vmatprep.mubr.msk.f32.mxu0 %vm84_vm0, %v28_v1  ;;  %569 = vmatpush3.msra.mxu0 %v27_v0  ;;  %v36_v5 = vld [vmem:[%s871_s2] sm:$0xff]  ;;  %v37_v9 = vld [vmem:[%s871_s2 + $0x8] sm:$0xff]  ;;  %v39_v10 = vld [vmem:[%s871_s2 + $0x18] sm:$0xff] }
   0x4   :  { %571 = vmatmul.mubr.msk.f32.vlgmr.msra.gmra.mrb[0].mxu0 %vm84_vm0, %v29_v2  ;;  %46 = vperm.xlu0 %662, %v36_v5   ;;  %v32_v8 = vld [vmem:[%s870_s1 + $0x20] sm:$0xff]  ;;  %v33_v11 = vld [vmem:[%s870_s1 + $0x28] sm:$0xff] }
   0x5   :  { %573 = vmatprep.mubr.msk.f32.mxu0 %vm84_vm0, %v30_v3  ;;  %56 = vperm.xlu1 %663, %v38_v6  }
   0x8   :  { %574 = vmatmul.mubr.msk.f32.gmra.mrb[2].mxu0 %vm84_vm0, %v31_v7  ;;  %51 = vperm.xlu0 %662, %v37_v9  }
   0x9   :  { %576 = vmatprep.mubr.msk.f32.mxu0 %vm84_vm0, %v32_v8 }
   0xa   :  { %12 = vsyncpa [#allocation3], 0  ;;  %v34_v12 = vld [vmem:[%s870_s1 + $0x30] sm:$0xff]  ;;  %v40_v13 = vld [vmem:[%s871_s2 + $0x20] sm:$0xff]  ;;  %61 = vperm.xlu1 %663, %v39_v10   ;;  %vm278_vm1 = vcmask 523264   ;;  %v691_v7 = vmov 0.0|0.0  }
   0xb   :  { %v41_v14 = vld [vmem:[%s871_s2 + $0x28] sm:$0xff]  ;;  %v35_v15 = vld [vmem:[%s870_s1 + $0x38] sm:$0xff]  ;;  %v42_v16 = vld [vmem:[%s871_s2 + $0x30] sm:$0xff]  ;;  %645 = vmatprep.subr.bf16.mxu0 %v691_v7  ;;  %vm692_vm2 = vmmov 0   ;;  %v693_v8 = vmov 0.0  }
   0xc   :  { %577 = vmatmul.mubr.msk.f32.gmra.mrb[4].mxu0 %vm84_vm0, %v33_v11  ;;  %66 = vperm.xlu0 %662, %v40_v13   ;;  %v43_v17 = vld [vmem:[%s871_s2 + $0x38] sm:$0xff]  ;;  %v230_v18 = vld [vmem:[%s873_s4] sm:$0xff]  ;;  %v231_v19 = vld [vmem:[%s873_s4 + $0x8] sm:$0xff]  ;;  %s694_s2 = smov [#allocation2]  }
   0xd   :  { %579 = vmatprep.mubr.msk.f32.mxu0 %vm84_vm0, %v34_v12  ;;  %v232_v20 = vld [vmem:[%s873_s4 + $0x10] sm:$0xff]  ;;  %v233_v21 = vld [vmem:[%s873_s4 + $0x18] sm:$0xff]  ;;  %v234_v22 = vld [vmem:[%s873_s4 + $0x20] sm:$0xff]  ;;  %s509_s16 = sshll.u32 %s694_s2, 4  ;;  %s510_s16 = int_to_ptr.vmem [resolvable:$true] %s509_s16 }
   0xe   :  { %71 = vperm.xlu1 %663, %v41_v14   ;;  %v235_v23 = vld [vmem:[%s873_s4 + $0x28] sm:$0xff]  ;;  %v236_v24 = vld [vmem:[%s873_s4 + $0x30] sm:$0xff]  ;;  %v237_v25 = vld [vmem:[%s873_s4 + $0x38] sm:$0xff]  ;;  %s666_s17 = scalar_lea.vmem %s510_s16, 128  ;;  %p671_p1 = scmp.lt.s32.totalorder %s510_s16, %s510_s16 }
   0xf   :  { %v417_v26 = vld [vmem:[%s875_s6] sm:$0xff]  ;;  %v223_v0 = vld [vmem:[%s872_s3 + $0x8] sm:$0xff]  ;;  %v224_v1 = vld [vmem:[%s872_s3 + $0x10] sm:$0xff]  ;;  %p667_p0 = scmp.ne.s32.totalorder %s510_s16, %s666_s17  ;;  %p672_p2 = scmp.lt.s32.totalorder %s666_s17, %s666_s17 }
  0x10   :  { %580 = vmatmul.mubr.msk.f32.gmra.mrb[6].mxu0 %vm84_vm0, %v35_v15  ;;  %76 = vperm.xlu0 %662, %v42_v16   ;;  %v222_v27 = vld [vmem:[%s872_s3] sm:$0xff]  ;;  %v225_v2 = vld [vmem:[%s872_s3 + $0x18] sm:$0xff]  ;;  %v227_v4 = vld [vmem:[%s872_s3 + $0x28] sm:$0xff] }
  0x11   :  { %598 = vmatprep.mubr.msk.f32.mxu1 %vm278_vm1, %v222_v27  ;;  %v226_v3 = vld [vmem:[%s872_s3 + $0x20] sm:$0xff]  ;;  %v228_v5 = vld [vmem:[%s872_s3 + $0x30] sm:$0xff]  ;;  %v229_v6 = vld [vmem:[%s872_s3 + $0x38] sm:$0xff]  ;;  %626 = vmatprep.mubr.msk.f32.mxu0 %vm692_vm2, %v693_v8  ;;  %p673_p3 = por %p672_p2, %p671_p1 }
  0x12   :  { %81 = vperm.xlu1 %663, %v43_v17  }
  0x13   :  { %p674_p4 = pnand %p673_p3, %p667_p0 }
  0x14   :  { %240 = vperm.xlu0 %662, %v230_v18  }
  0x16   :  { %245 = vperm.xlu1 %663, %v231_v19  }
  0x18   :  { %250 = vperm.xlu0 %662, %v232_v20  }
  0x1a   :  { %255 = vperm.xlu1 %663, %v233_v21  }
  0x1c   :  { %260 = vperm.xlu0 %662, %v234_v22  }
  0x1e   :  { %265 = vperm.xlu1 %663, %v235_v23  }
  0x20   :  { %270 = vperm.xlu0 %662, %v236_v24  }
  0x22   :  { %275 = vperm.xlu1 %663, %v237_v25  }
  0x24   :  { %420 = vperm.xlu0 %662, %v417_v26  }
  0x83   :  { %v47_v28 = vpop.permute.xlu0 %46 }
  0x84   :  { %v57_v29 = vpop.permute.xlu1 %56 }
  0x87   :  { %v52_v30 = vpop.permute.xlu0 %51 }
  0x89   :  { %v62_v31 = vpop.permute.xlu1 %61 }
  0x8b   :  { %v67_v44 = vpop.permute.xlu0 %66 }
  0x8d   :  { %v72_v41 = vpop.permute.xlu1 %71 }
  0x8f   :  { %v77_v56 = vpop.permute.xlu0 %76 }
  0x91   :  { %v82_v53 = vpop.permute.xlu1 %81 }
  0x93   :  { %v241_v10 = vpop.permute.xlu0 %240 }
  0x95   :  { %v246_v9 = vpop.permute.xlu1 %245 }
  0x97   :  { %v251_v13 = vpop.permute.xlu0 %250 }
  0x99   :  { %v256_v11 = vpop.permute.xlu1 %255 }
  0x9b   :  { %v261_v25 = vpop.permute.xlu0 %260 }
  0x9d   :  { %v266_v22 = vpop.permute.xlu1 %265 }
  0xd7   :  { %v572_v32 = vpop.f32.mrb[0].mxu0 }
  0xd8   :  { %v181_v33 = vadd.f32 %v572_v32, %v52_v30  ;;  %v175_v34 = vpop.f32.mrb[1].mxu0 }
  0xd9   :  { %v176_v35 = vadd.f32 %v175_v34, %v47_v28  ;;  %v276_v34 = vpop.permute.xlu1 %275 }
  0xda   :  { %v215_v36 = vmax.f32 %v181_v33, 0.0 }
  0xdb   :  { %v214_v37 = vmax.f32 %v176_v35, 0.0  ;;  %v575_v38 = vpop.f32.mrb[2].mxu0 }
  0xdc   :  { %v191_v39 = vadd.f32 %v575_v38, %v62_v31  ;;  %v185_v40 = vpop.f32.mrb[3].mxu0 }
  0xdd   :  { %v186_v42 = vadd.f32 %v185_v40, %v57_v29  ;;  %v629_v43 = vpack.c.bf16 %v215_v36, %v214_v37  ;;  %v271_v37 = vpop.permute.xlu0 %270 }
  0xde   :  { %v217_v45 = vmax.f32 %v191_v39, 0.0 }
  0xdf   :  { %v216_v46 = vmax.f32 %v186_v42, 0.0  ;;  %v578_v47 = vpop.f32.mrb[4].mxu0  ;;  %630 = vmatprep.subr.bf16.mxu1 %v629_v43 }
  0xe0   :  { %v201_v48 = vadd.f32 %v578_v47, %v72_v41  ;;  %v195_v49 = vpop.f32.mrb[5].mxu0  ;;  %632 = vmatpush3.bf16.msra.mxu1 %v629_v43 }
  0xe1   :  { %v633_v50 = vpack.c.bf16 %v217_v45, %v216_v46  ;;  %v196_v51 = vadd.f32 %v195_v49, %v67_v44  ;;  %v416_v45 = vld [vmem:[%s874_s5] sm:$0xff]  ;;  %v421_v46 = vpop.permute.xlu0 %420 }
  0xe2   :  { %v219_v52 = vmax.f32 %v201_v48, 0.0 }
  0xe3   :  { %v218_v54 = vmax.f32 %v196_v51, 0.0  ;;  %v581_v55 = vpop.f32.mrb[6].mxu0  ;;  %634 = vmatprep.subr.bf16.mxu1 %v633_v50 }
  0xe4   :  { %v211_v57 = vadd.f32 %v581_v55, %v82_v53  ;;  %v205_v58 = vpop.f32.mrb[7].mxu0  ;;  %636 = vmatpush3.bf16.msra.mxu1 %v633_v50  ;;  %v496_v50 = vlaneseq }
  0xe5   :  { %v637_v59 = vpack.c.bf16 %v219_v52, %v218_v54  ;;  %v206_v60 = vadd.f32 %v205_v58, %v77_v56 }
  0xe6   :  { %v221_v61 = vmax.f32 %v211_v57, 0.0  ;;  %v497_v51 = vshrl.u32 %v496_v50, 7 }
  0xe7   :  { %v220_v62 = vmax.f32 %v206_v60, 0.0  ;;  %638 = vmatprep.subr.bf16.mxu1 %v637_v59 }
  0xe8   :  { %640 = vmatpush3.bf16.msra.mxu1 %v637_v59  ;;  %vm498_vm3 = vcmp.lt.s32.totalorder %v497_v51, 2 }
  0xe9   :  { %v641_v63 = vpack.c.bf16 %v221_v61, %v220_v62 }
  0xeb   :  { %642 = vmatprep.subr.bf16.mxu1 %v641_v63 }
  0xec   :  { %644 = vmatpush3.bf16.msra.mxu1 %v641_v63 }
  0xef   :  { %599 = vmatmul.mubr.msk.f32.vlgmr.msra.gmra.mrb[0].mxu1 %vm278_vm1, %v223_v0 }
  0xf0   :  { %601 = vmatprep.mubr.msk.f32.mxu1 %vm278_vm1, %v224_v1 }
  0xf3   :  { %602 = vmatmul.mubr.msk.f32.gmra.mrb[2].mxu1 %vm278_vm1, %v225_v2 }
  0xf4   :  { %604 = vmatprep.mubr.msk.f32.mxu1 %vm278_vm1, %v226_v3 }
  0xf7   :  { %605 = vmatmul.mubr.msk.f32.gmra.mrb[4].mxu1 %vm278_vm1, %v227_v4 }
  0xf8   :  { %607 = vmatprep.mubr.msk.f32.mxu1 %vm278_vm1, %v228_v5 }
  0xfb   :  { %608 = vmatmul.mubr.msk.f32.gmra.mrb[6].mxu1 %vm278_vm1, %v229_v6 }
 0x1c2   :  { %v600_v12 = vpop.f32.mrb[0].mxu1 }
 0x1c3   :  { %v375_v14 = vadd.f32 %v600_v12, %v246_v9  ;;  %v369_v15 = vpop.f32.mrb[1].mxu1 }
 0x1c4   :  { %v370_v16 = vadd.f32 %v369_v15, %v241_v10 }
 0x1c5   :  { %v409_v17 = vmax.f32 %v375_v14, 0.0 }
 0x1c6   :  { %v408_v18 = vmax.f32 %v370_v16, 0.0  ;;  %v603_v19 = vpop.f32.mrb[2].mxu1 }
 0x1c7   :  { %v385_v20 = vadd.f32 %v603_v19, %v256_v11  ;;  %v379_v21 = vpop.f32.mrb[3].mxu1 }
 0x1c8   :  { %v646_v23 = vpack.c.bf16 %v409_v17, %v408_v18  ;;  %v380_v24 = vadd.f32 %v379_v21, %v251_v13 }
 0x1c9   :  { %v411_v26 = vmax.f32 %v385_v20, 0.0 }
 0x1ca   :  { %v410_v27 = vmax.f32 %v380_v24, 0.0  ;;  %v606_v28 = vpop.f32.mrb[4].mxu1  ;;  %647 = vmatpush3.bf16.msra.mxu0 %v646_v23 }
 0x1cb   :  { %v395_v29 = vadd.f32 %v606_v28, %v266_v22  ;;  %v389_v30 = vpop.f32.mrb[5].mxu1  ;;  %648 = vmatprep.subr.bf16.mxu0 %v691_v7 }
 0x1cc   :  { %v649_v31 = vpack.c.bf16 %v411_v26, %v410_v27  ;;  %v390_v32 = vadd.f32 %v389_v30, %v261_v25 }
 0x1cd   :  { %v413_v33 = vmax.f32 %v395_v29, 0.0 }
 0x1ce   :  { %v412_v35 = vmax.f32 %v390_v32, 0.0  ;;  %v609_v36 = vpop.f32.mrb[6].mxu1  ;;  %650 = vmatpush3.bf16.msra.mxu0 %v649_v31 }
 0x1cf   :  { %v405_v38 = vadd.f32 %v609_v36, %v276_v34  ;;  %v399_v39 = vpop.f32.mrb[7].mxu1  ;;  %651 = vmatprep.subr.bf16.mxu0 %v691_v7 }
 0x1d0   :  { %v652_v40 = vpack.c.bf16 %v413_v33, %v412_v35  ;;  %v400_v41 = vadd.f32 %v399_v39, %v271_v37 }
 0x1d1   :  { %v415_v42 = vmax.f32 %v405_v38, 0.0 }
 0x1d2   :  { %v414_v43 = vmax.f32 %v400_v41, 0.0  ;;  %653 = vmatpush3.bf16.msra.mxu0 %v652_v40 }
 0x1d3   :  { %654 = vmatprep.subr.bf16.mxu0 %v691_v7 }
 0x1d4   :  { %v655_v44 = vpack.c.bf16 %v415_v42, %v414_v43 }
 0x1d6   :  { %656 = vmatpush3.bf16.msra.mxu0 %v655_v44 }
 0x1d9   :  { %627 = vmatmul.mubr.msk.f32.vlgmr.msra.gmra.mrb[8].mxu0 %vm278_vm1, %v416_v45 }
 0x2ac   :  { %v492_v47 = vpop.f32.mrb[8].mxu0 }
 0x2ad   :  { %v493_v48 = vadd.f32 %v492_v47, %v421_v46  ;;  %v628_v49 = vpop.f32.mrb[9].mxu0 }
 0x2af   :  { %664 = vtanh.f32 %v493_v48 }
 0x2b9   :  { %v665_v52 = vpop.eup %664 }
 0x2ba   :  { %v500_v53 = vmul.f32 2.0, %v665_v52 }
 0x2bc   :  { %v501_v54 = vsel %vm498_vm3, %v500_v53, %v493_v48 }
 0x2bd   :  { %502 = vst [vmem:[#allocation2] sm:$0xff] %v501_v54 }
 0x2be   :  { %677 = shalt.err (!%p674_p4)
}
 0x2bf   :  { %s678_s19 = scalar_lea.hbm %s876_s7, 128 }
 0x2c0   :  { %p679_p5 = scmp.ne.s32.totalorder %s876_s7, %s678_s19  ;;  %p682_p6 = scmp.lt.u32.totalorder %s678_s19, %s876_s7 }
 0x2c2   :  { %p684_p7 = pnand %p682_p6, %p679_p5 }
 0x2c4   :  { %687 = shalt.err (!%p684_p7)
}
 0x2c5   :  { %512 = dma.vmem_to_hbm [thread:$0]  %s510_s16, 128, %s876_s7, [#allocation3]  }
 0x2c6   :  { %688 = dma.done.wait [#allocation3], 128  }
 0x2c7   :  { %689 = vsyncadd [#allocation3], 4294967168 }
 0x2c8   :  { %516 = vsyncpa [#allocation3], 1 }

</bundles_post_ra>
